<compile_context>
chip_gen: v5e
topology: v5e:2x2
jax: 0.10.0
libtpu: 0.0.40
codegen_flags: <defaults>
</compile_context>

<pallas_src>
import functools
import math

import jax
import jax.numpy as jnp
from jax.experimental import pallas as pl
from jax.experimental.pallas import tpu as pltpu


# ----------------------------------------------------------------------------
# Fused Pallas kernel: one (row_tile, step) grid point of the whole cell.
# ----------------------------------------------------------------------------
def _evolved_cell_kernel(arch_ref, s01_ref, mask_ref, wf_ref, wffn_ref,
                         wcat_ref, bf_ref, bx_ref, o_ref, st_ref,
                         *, steps, n_max, C):
    # arch_ref : SMEM f32[steps, 2*n_max + 17]
    #            per-step row: left_input[n_max] | right_input[n_max] |
    #            left_layer[3] | right_layer[3] | left_act[3] | right_act[3] |
    #            combine[3] | norm[2]   (input-mix slots zero-padded to n_max)
    # s01_ref  : VMEM f32 [2, tile_n, C]      initial states s0, s1 (row tile)
    # mask_ref : VMEM f32 [tile_n, 1]
    # wf_ref   : VMEM bf16[1, 2, C, 2C]       per-step fused [W_lin | W_ffn_a] (L/R)
    # wffn_ref : VMEM bf16[1, 2, C, C]        per-step W_ffn_b (L/R)
    # wcat_ref : VMEM bf16[1, 2C, C]          per-step concat-linear weight
    # bf_ref   : VMEM f32 [1, 2, 1, 2C]       per-step fused [b_lin | b_ffn_a] (L/R)
    # bx_ref   : VMEM f32 [1, 5, 1, C]        rows: b_ffn_b_L, b_ffn_b_R, b_cat, gamma, beta
    # o_ref    : VMEM f32 [tile_n, C]         final state (row tile)
    # st_ref   : VMEM f32 [steps + 2, tile_n, C]  growing state list (scratch)
    t = pl.program_id(1)
    L = 2 * n_max
    tile_n = o_ref.shape[0]

    @pl.when(t == 0)
    def _init():
        st_ref[0] = s01_ref[0]
        st_ref[1] = s01_ref[1]
        # Zero the not-yet-computed slots that can be read (with zero arch
        # weight) so uninitialized VMEM never mixes into the sums.
        for s in range(2, steps + 1):
            st_ref[s] = jnp.zeros((tile_n, C), jnp.float32)

    # Hoist the mask lane-broadcast once (used by both branches).
    mask_c = jnp.broadcast_to(mask_ref[...], (tile_n, C))

    def branch(bi, in_off, lay_off, act_off):
        # (1) weighted sum over candidate input states (zero-padded weights)
        x = arch_ref[t, in_off] * st_ref[0]
        for s in range(1, n_max):
            x = x + arch_ref[t, in_off + s] * st_ref[s]
        # (2) weighted mix of layer ops: identity, linear, ffn.
        #     linear and the first ffn matmul share the LHS -> one fused dot.
        xb = x.astype(jnp.bfloat16)
        y = jnp.dot(xb, wf_ref[0, bi],
                    preferred_element_type=jnp.float32) + bf_ref[0, bi]
        lin = y[:, :C]
        h = jnp.maximum(y[:, C:], 0.0)
        ffn = jnp.dot(h.astype(jnp.bfloat16), wffn_ref[0, bi],
                      preferred_element_type=jnp.float32) + bx_ref[0, bi]
        x = (arch_ref[t, lay_off] * x
             + arch_ref[t, lay_off + 1] * lin
             + arch_ref[t, lay_off + 2] * ffn) * mask_c
        # (3) weighted mix of activation ops: none, relu, sigmoid (f32 VPU/EUP)
        x = (arch_ref[t, act_off] * x
             + arch_ref[t, act_off + 1] * jnp.maximum(x, 0.0)
             + arch_ref[t, act_off + 2] * jax.nn.sigmoid(x))
        return x

    left = branch(0, 0, L, L + 6)
    right = branch(1, n_max, L + 3, L + 9)

    # (4) weighted mix of combine ops: add, mul, concat->linear (one K=2C dot)
    lr = jnp.concatenate([left, right], axis=-1).astype(jnp.bfloat16)
    cat_lin = jnp.dot(lr, wcat_ref[0],
                      preferred_element_type=jnp.float32) + bx_ref[0, 2]
    c = L + 12
    x = (arch_ref[t, c] * (left + right)
         + arch_ref[t, c + 1] * (left * right)
         + arch_ref[t, c + 2] * cat_lin)

    # (5) weighted mix of norm ops: layer_norm (single-sweep stats), identity
    inv_c = 1.0 / C
    mu = jnp.sum(x, axis=-1, keepdims=True) * inv_c
    var = jnp.maximum(jnp.sum(x * x, axis=-1, keepdims=True) * inv_c - mu * mu, 0.0)
    ln = (x - mu) * jax.lax.rsqrt(var + 1e-5) * bx_ref[0, 3] + bx_ref[0, 4]
    s_new = arch_ref[t, c + 3] * ln + arch_ref[t, c + 4] * x

    # Append the new state to the in-VMEM state list.
    st_ref[2 + t] = s_new

    @pl.when(t == steps - 1)
    def _finalize():
        o_ref[...] = s_new


# ----------------------------------------------------------------------------
# Host-side packing of architecture weights / parameters into kernel layout.
# ----------------------------------------------------------------------------
def _pack_arch(weights, steps, n_max):
    rows = []
    for i, w in enumerate(weights):
        n = 2 + i
        li = jnp.zeros((n_max,), jnp.float32).at[:n].set(w['left_input'])
        ri = jnp.zeros((n_max,), jnp.float32).at[:n].set(w['right_input'])
        rows.append(jnp.concatenate([
            li, ri, w['left_layer'], w['right_layer'],
            w['left_activation'], w['right_activation'],
            w['combine_func'], w['norm']]).astype(jnp.float32))
    return jnp.stack(rows, axis=0)                     # [steps, 2*n_max + 17]


def _pack_params(params):
    w_fused = jnp.stack([jnp.stack([
        jnp.concatenate([p['Wl'][0], p['Wl'][1]], axis=1),
        jnp.concatenate([p['Wr'][0], p['Wr'][1]], axis=1)], 0) for p in params], 0)
    w_ffn = jnp.stack([jnp.stack([p['Wl'][2], p['Wr'][2]], 0) for p in params], 0)
    w_cat = jnp.stack([jnp.concatenate([p['Wc'][0], p['Wc'][1]], axis=0)
                       for p in params], 0)
    b_fused = jnp.stack([jnp.stack([
        jnp.concatenate([p['bl'][0], p['bl'][1]])[None, :],
        jnp.concatenate([p['br'][0], p['br'][1]])[None, :]], 0) for p in params], 0)
    b_rest = jnp.stack([jnp.stack([
        p['bl'][2][None, :], p['br'][2][None, :], p['bc'][None, :],
        p['gamma'][None, :], p['beta'][None, :]], 0) for p in params], 0)
    return (w_fused.astype(jnp.bfloat16), w_ffn.astype(jnp.bfloat16),
            w_cat.astype(jnp.bfloat16),
            b_fused.astype(jnp.float32), b_rest.astype(jnp.float32))


# ----------------------------------------------------------------------------
# Wrapper: the whole EvolvedCell forward in one pallas_call.
# ----------------------------------------------------------------------------
def evolved_cell_forward(s0, s1, weights, mask, params):
    B, T, C = s0.shape
    N = B * T
    steps = len(weights)
    n_max = steps + 1                      # max number of input states read

    assert N % 8 == 0, "rows must be a multiple of 8 (sublane constraint)"
    tile_n = N if N <= 512 else 512        # biggest row tile that fits VMEM easily
    assert N % tile_n == 0

    s01 = jnp.stack([s0.reshape(N, C), s1.reshape(N, C)], 0).astype(jnp.float32)
    mask_flat = mask.reshape(N, 1).astype(jnp.float32)
    arch = _pack_arch(weights, steps, n_max)
    w_fused, w_ffn, w_cat, b_fused, b_rest = _pack_params(params)

    grid = (N // tile_n, steps)            # rows parallel, steps sequential

    out = pl.pallas_call(
        functools.partial(_evolved_cell_kernel, steps=steps, n_max=n_max, C=C),
        out_shape=jax.ShapeDtypeStruct((N, C), jnp.float32),
        grid=grid,
        in_specs=[
            pl.BlockSpec(memory_space=pltpu.MemorySpace.SMEM),            # arch
            pl.BlockSpec((2, tile_n, C), lambda r, t: (0, r, 0)),         # s0/s1
            pl.BlockSpec((tile_n, 1), lambda r, t: (r, 0)),               # mask
            pl.BlockSpec((1, 2, C, 2 * C), lambda r, t: (t, 0, 0, 0)),    # fused W (L/R)
            pl.BlockSpec((1, 2, C, C), lambda r, t: (t, 0, 0, 0)),        # ffn W (L/R)
            pl.BlockSpec((1, 2 * C, C), lambda r, t: (t, 0, 0)),          # concat W
            pl.BlockSpec((1, 2, 1, 2 * C), lambda r, t: (t, 0, 0, 0)),    # fused biases
            pl.BlockSpec((1, 5, 1, C), lambda r, t: (t, 0, 0, 0)),        # rest biases/ln
        ],
        out_specs=pl.BlockSpec((tile_n, C), lambda r, t: (r, 0)),
        scratch_shapes=[pltpu.VMEM((steps + 2, tile_n, C), jnp.float32)],
        compiler_params=pltpu.CompilerParams(
            dimension_semantics=("parallel", "arbitrary")),
    )(arch, s01, mask_flat, w_fused, w_ffn, w_cat, b_fused, b_rest)
    return out.reshape(B, T, C)


# ----------------------------------------------------------------------------
# Pure-JAX reference (same math, same bf16 dot numerics) for correctness check
# ----------------------------------------------------------------------------
def _bf16_dot(a, b):
    return jnp.dot(a.astype(jnp.bfloat16), b.astype(jnp.bfloat16),
                   preferred_element_type=jnp.float32)


def _two_branch_ref(states, w, mask_flat, p):
    xs = jnp.stack(states, 0)

    def branch(win, wl, wa, W3, b3):
        x = jnp.sum(xs * win[:, None, None], axis=0)
        lin = _bf16_dot(x, W3[0]) + b3[0]
        h = jnp.maximum(_bf16_dot(x, W3[1]) + b3[1], 0.0)
        ffn = _bf16_dot(h, W3[2]) + b3[2]
        x = (wl[0] * x + wl[1] * lin + wl[2] * ffn) * mask_flat
        return wa[0] * x + wa[1] * jnp.maximum(x, 0.0) + wa[2] * jax.nn.sigmoid(x)

    l = branch(w['left_input'], w['left_layer'], w['left_activation'], p['Wl'], p['bl'])
    r = branch(w['right_input'], w['right_layer'], w['right_activation'], p['Wr'], p['br'])
    cat_lin = _bf16_dot(l, p['Wc'][0]) + _bf16_dot(r, p['Wc'][1]) + p['bc']
    wc = w['combine_func']
    x = wc[0] * (l + r) + wc[1] * (l * r) + wc[2] * cat_lin
    mu = jnp.mean(x, -1, keepdims=True)
    var = jnp.mean((x - mu) ** 2, -1, keepdims=True)
    ln = (x - mu) * jax.lax.rsqrt(var + 1e-5) * p['gamma'] + p['beta']
    wn = w['norm']
    return wn[0] * ln + wn[1] * x


def evolved_cell_ref(s0, s1, weights, mask, params):
    B, T, C = s0.shape
    N = B * T
    mask_flat = mask.reshape(N, 1).astype(jnp.float32)
    states = [s0.reshape(N, C).astype(jnp.float32),
              s1.reshape(N, C).astype(jnp.float32)]
    for i in range(len(weights)):
        states.append(_two_branch_ref(states, weights[i], mask_flat, params[i]))
    return states[-1].reshape(B, T, C)


# ----------------------------------------------------------------------------
# Deterministic parameter / architecture-weight construction
# ----------------------------------------------------------------------------
def init_step_params(key, C):
    ks = jax.random.split(key, 6)
    scale = 1.0 / math.sqrt(C)
    u = lambda k, shape: jax.random.uniform(k, shape, jnp.float32, -scale, scale)
    return {
        'Wl': u(ks[0], (3, C, C)), 'bl': u(ks[1], (3, C)),      # W_lin, W_ffn_a, W_ffn_b
        'Wr': u(ks[2], (3, C, C)), 'br': u(ks[3], (3, C)),
        'Wc': u(ks[4], (2, C, C)), 'bc': u(ks[5], (C,)),        # concat-linear (L, R halves)
        'gamma': jnp.ones((C,), jnp.float32),
        'beta': jnp.zeros((C,), jnp.float32),
    }


def init_step_weights(key, n_states):
    sizes = [('left_input', n_states), ('right_input', n_states),
             ('left_layer', 3), ('right_layer', 3),
             ('left_activation', 3), ('right_activation', 3),
             ('combine_func', 3), ('norm', 2)]
    ks = jax.random.split(key, len(sizes))
    return {name: jax.nn.softmax(jax.random.normal(k, (sz,), jnp.float32))
            for (name, sz), k in zip(sizes, ks)}


if __name__ == "__main__":
    B, T, C, STEPS = 2, 8, 32, 3

    key = jax.random.PRNGKey(0)
    k0, k1 = jax.random.split(key)
    s0 = jax.random.normal(k0, (B, T, C), jnp.float32)
    s1 = jax.random.normal(k1, (B, T, C), jnp.float32)
    # padding mask: sample 0 keeps all 8 positions, sample 1 keeps the first 6
    valid_len = jnp.array([T, 6])
    mask = (jnp.arange(T)[None, :] < valid_len[:, None]).astype(jnp.float32)  # [B, T]

    weights = [init_step_weights(jax.random.fold_in(key, 100 + i), 2 + i)
               for i in range(STEPS)]
    params = [init_step_params(jax.random.fold_in(key, 200 + i), C)
              for i in range(STEPS)]

    out = evolved_cell_forward(s0, s1, weights, mask, params)
    out = jax.block_until_ready(out)

    ref = evolved_cell_ref(s0, s1, weights, mask, params)
    err = float(jnp.max(jnp.abs(out - ref)))
    assert out.shape == (B, T, C) and err < 5e-3, f"mismatch: max abs err {err}"

    print("KERNEL_OK")
</pallas_src>

<mosaic_0001>
module attributes {stable_mosaic.version = 11 : i64} {
  func.func @_evolved_cell_kernel(%arg0: i32, %arg1: i32, %arg2: memref<3x25xf32, #tpu.memory_space<smem>>, %arg3: memref<2x16x32xf32, #tpu.memory_space<vmem>>, %arg4: memref<16x1xf32, #tpu.memory_space<vmem>>, %arg5: memref<1x2x32x64xbf16, #tpu.memory_space<vmem>>, %arg6: memref<1x2x32x32xbf16, #tpu.memory_space<vmem>>, %arg7: memref<1x64x32xbf16, #tpu.memory_space<vmem>>, %arg8: memref<1x2x1x64xf32, #tpu.memory_space<vmem>>, %arg9: memref<1x5x1x32xf32, #tpu.memory_space<vmem>>, %arg10: memref<16x32xf32, #tpu.memory_space<vmem>>, %arg11: memref<5x16x32xf32, #tpu.memory_space<vmem>>) attributes {dimension_semantics = [#tpu.dimension_semantics<parallel>, #tpu.dimension_semantics<arbitrary>], iteration_bounds = array<i64: 1, 3>, scalar_prefetch = 0 : i64, scratch_operands = 1 : i64, tpu.core_type = #tpu.core_type<tc>, window_params = [{transform_indices = @transform_0, window_bounds = array<i64: 3, 25>}, {transform_indices = @transform_1, window_bounds = array<i64: 2, 16, 32>}, {transform_indices = @transform_2, window_bounds = array<i64: 16, 1>}, {transform_indices = @transform_3, window_bounds = array<i64: 1, 2, 32, 64>}, {transform_indices = @transform_4, window_bounds = array<i64: 1, 2, 32, 32>}, {transform_indices = @transform_5, window_bounds = array<i64: 1, 64, 32>}, {transform_indices = @transform_6, window_bounds = array<i64: 1, 2, 1, 64>}, {transform_indices = @transform_7, window_bounds = array<i64: 1, 5, 1, 32>}, {transform_indices = @transform_8, window_bounds = array<i64: 16, 32>}]} {
    %c0_i32 = arith.constant 0 : i32
    %0 = arith.cmpi eq, %arg1, %c0_i32 : i32
    %1 = arith.extui %0 : i1 to i32
    %c0_i32_0 = arith.constant 0 : i32
    %2 = arith.cmpi ne, %1, %c0_i32_0 : i32
    scf.if %2 {
      %c0_94 = arith.constant 0 : index
      %c0_95 = arith.constant 0 : index
      %c0_96 = arith.constant 0 : index
      %242 = vector.load %arg3[%c0_94, %c0_95, %c0_96] : memref<2x16x32xf32, #tpu.memory_space<vmem>>, vector<1x16x32xf32>
      %243 = vector.shape_cast %242 : vector<1x16x32xf32> to vector<16x32xf32>
      %c0_97 = arith.constant 0 : index
      %c0_98 = arith.constant 0 : index
      %c0_99 = arith.constant 0 : index
      %244 = vector.load %arg11[%c0_97, %c0_98, %c0_99] : memref<5x16x32xf32, #tpu.memory_space<vmem>>, vector<1x16x32xf32>
      %245 = vector.shape_cast %244 : vector<1x16x32xf32> to vector<16x32xf32>
      %246 = vector.shape_cast %243 : vector<16x32xf32> to vector<1x16x32xf32>
      tpu.vector_store %arg11[%c0_97, %c0_98, %c0_99], %246 {strides = array<i32>} : memref<5x16x32xf32, #tpu.memory_space<vmem>>, vector<1x16x32xf32>,
      %c1_100 = arith.constant 1 : index
      %c0_101 = arith.constant 0 : index
      %c0_102 = arith.constant 0 : index
      %247 = vector.load %arg3[%c1_100, %c0_101, %c0_102] : memref<2x16x32xf32, #tpu.memory_space<vmem>>, vector<1x16x32xf32>
      %248 = vector.shape_cast %247 : vector<1x16x32xf32> to vector<16x32xf32>
      %c1_103 = arith.constant 1 : index
      %c0_104 = arith.constant 0 : index
      %c0_105 = arith.constant 0 : index
      %249 = vector.load %arg11[%c1_103, %c0_104, %c0_105] : memref<5x16x32xf32, #tpu.memory_space<vmem>>, vector<1x16x32xf32>
      %250 = vector.shape_cast %249 : vector<1x16x32xf32> to vector<16x32xf32>
      %251 = vector.shape_cast %248 : vector<16x32xf32> to vector<1x16x32xf32>
      tpu.vector_store %arg11[%c1_103, %c0_104, %c0_105], %251 {strides = array<i32>} : memref<5x16x32xf32, #tpu.memory_space<vmem>>, vector<1x16x32xf32>,
      %cst_106 = arith.constant 0.000000e+00 : f32
      %252 = vector.broadcast %cst_106 : f32 to vector<16x32xf32>
      %c2_107 = arith.constant 2 : index
      %c0_108 = arith.constant 0 : index
      %c0_109 = arith.constant 0 : index
      %253 = vector.load %arg11[%c2_107, %c0_108, %c0_109] : memref<5x16x32xf32, #tpu.memory_space<vmem>>, vector<1x16x32xf32>
      %254 = vector.shape_cast %253 : vector<1x16x32xf32> to vector<16x32xf32>
      %255 = vector.shape_cast %252 : vector<16x32xf32> to vector<1x16x32xf32>
      tpu.vector_store %arg11[%c2_107, %c0_108, %c0_109], %255 {strides = array<i32>} : memref<5x16x32xf32, #tpu.memory_space<vmem>>, vector<1x16x32xf32>,
      %cst_110 = arith.constant 0.000000e+00 : f32
      %256 = vector.broadcast %cst_110 : f32 to vector<16x32xf32>
      %c3_111 = arith.constant 3 : index
      %c0_112 = arith.constant 0 : index
      %c0_113 = arith.constant 0 : index
      %257 = vector.load %arg11[%c3_111, %c0_112, %c0_113] : memref<5x16x32xf32, #tpu.memory_space<vmem>>, vector<1x16x32xf32>
      %258 = vector.shape_cast %257 : vector<1x16x32xf32> to vector<16x32xf32>
      %259 = vector.shape_cast %256 : vector<16x32xf32> to vector<1x16x32xf32>
      tpu.vector_store %arg11[%c3_111, %c0_112, %c0_113], %259 {strides = array<i32>} : memref<5x16x32xf32, #tpu.memory_space<vmem>>, vector<1x16x32xf32>,
    } else {
    }
    %c0 = arith.constant 0 : index
    %c0_1 = arith.constant 0 : index
    %3 = vector.load %arg4[%c0, %c0_1] : memref<16x1xf32, #tpu.memory_space<vmem>>, vector<16x1xf32>
    %4 = vector.shape_cast %3 : vector<16x1xf32> to vector<16x1xf32>
    %5 = vector.broadcast %4 : vector<16x1xf32> to vector<16x32xf32>
    %6 = arith.index_cast %arg1 : i32 to index
    %c0_2 = arith.constant 0 : index
    %7 = memref.load %arg2[%6, %c0_2] : memref<3x25xf32, #tpu.memory_space<smem>>
    %c0_3 = arith.constant 0 : index
    %c0_4 = arith.constant 0 : index
    %c0_5 = arith.constant 0 : index
    %8 = vector.load %arg11[%c0_3, %c0_4, %c0_5] : memref<5x16x32xf32, #tpu.memory_space<vmem>>, vector<1x16x32xf32>
    %9 = vector.shape_cast %8 : vector<1x16x32xf32> to vector<16x32xf32>
    %10 = vector.broadcast %7 : f32 to vector<16x32xf32>
    %11 = arith.mulf %10, %9 : vector<16x32xf32>
    %12 = arith.index_cast %arg1 : i32 to index
    %c1 = arith.constant 1 : index
    %13 = memref.load %arg2[%12, %c1] : memref<3x25xf32, #tpu.memory_space<smem>>
    %c1_6 = arith.constant 1 : index
    %c0_7 = arith.constant 0 : index
    %c0_8 = arith.constant 0 : index
    %14 = vector.load %arg11[%c1_6, %c0_7, %c0_8] : memref<5x16x32xf32, #tpu.memory_space<vmem>>, vector<1x16x32xf32>
    %15 = vector.shape_cast %14 : vector<1x16x32xf32> to vector<16x32xf32>
    %16 = vector.broadcast %13 : f32 to vector<16x32xf32>
    %17 = arith.mulf %16, %15 : vector<16x32xf32>
    %18 = arith.addf %11, %17 : vector<16x32xf32>
    %19 = arith.index_cast %arg1 : i32 to index
    %c2 = arith.constant 2 : index
    %20 = memref.load %arg2[%19, %c2] : memref<3x25xf32, #tpu.memory_space<smem>>
    %c2_9 = arith.constant 2 : index
    %c0_10 = arith.constant 0 : index
    %c0_11 = arith.constant 0 : index
    %21 = vector.load %arg11[%c2_9, %c0_10, %c0_11] : memref<5x16x32xf32, #tpu.memory_space<vmem>>, vector<1x16x32xf32>
    %22 = vector.shape_cast %21 : vector<1x16x32xf32> to vector<16x32xf32>
    %23 = vector.broadcast %20 : f32 to vector<16x32xf32>
    %24 = arith.mulf %23, %22 : vector<16x32xf32>
    %25 = arith.addf %18, %24 : vector<16x32xf32>
    %26 = arith.index_cast %arg1 : i32 to index
    %c3 = arith.constant 3 : index
    %27 = memref.load %arg2[%26, %c3] : memref<3x25xf32, #tpu.memory_space<smem>>
    %c3_12 = arith.constant 3 : index
    %c0_13 = arith.constant 0 : index
    %c0_14 = arith.constant 0 : index
    %28 = vector.load %arg11[%c3_12, %c0_13, %c0_14] : memref<5x16x32xf32, #tpu.memory_space<vmem>>, vector<1x16x32xf32>
    %29 = vector.shape_cast %28 : vector<1x16x32xf32> to vector<16x32xf32>
    %30 = vector.broadcast %27 : f32 to vector<16x32xf32>
    %31 = arith.mulf %30, %29 : vector<16x32xf32>
    %32 = arith.addf %25, %31 : vector<16x32xf32>
    %33 = arith.truncf %32 : vector<16x32xf32> to vector<16x32xbf16>
    %c0_15 = arith.constant 0 : index
    %c0_16 = arith.constant 0 : index
    %c0_17 = arith.constant 0 : index
    %c0_18 = arith.constant 0 : index
    %34 = vector.load %arg5[%c0_15, %c0_16, %c0_17, %c0_18] : memref<1x2x32x64xbf16, #tpu.memory_space<vmem>>, vector<1x1x32x64xbf16>
    %35 = vector.shape_cast %34 : vector<1x1x32x64xbf16> to vector<32x64xbf16>
    %cst = arith.constant dense<0.000000e+00> : vector<16x64xf32>
    %36 = tpu.matmul %33, %35, %cst {dimension_numbers = #tpu.dot_dimension_numbers<[1], [0], [0], [1], [0, 0, 1, 1], [], []>} : vector<16x32xbf16>, vector<32x64xbf16>, vector<16x64xf32> -> vector<16x64xf32>
    %c0_19 = arith.constant 0 : index
    %c0_20 = arith.constant 0 : index
    %c0_21 = arith.constant 0 : index
    %c0_22 = arith.constant 0 : index
    %37 = vector.load %arg8[%c0_19, %c0_20, %c0_21, %c0_22] : memref<1x2x1x64xf32, #tpu.memory_space<vmem>>, vector<1x1x1x64xf32>
    %38 = vector.shape_cast %37 : vector<1x1x1x64xf32> to vector<1x64xf32>
    %39 = vector.broadcast %38 : vector<1x64xf32> to vector<16x64xf32>
    %40 = arith.addf %36, %39 : vector<16x64xf32>
    %41 = vector.extract_strided_slice %40 {offsets = [0, 0], sizes = [16, 32], strides = [1, 1]} : vector<16x64xf32> to vector<16x32xf32>
    %42 = vector.extract_strided_slice %40 {offsets = [0, 32], sizes = [16, 32], strides = [1, 1]} : vector<16x64xf32> to vector<16x32xf32>
    %cst_23 = arith.constant 0.000000e+00 : f32
    %43 = vector.broadcast %cst_23 : f32 to vector<16x32xf32>
    %44 = arith.maximumf %42, %43 : vector<16x32xf32>
    %45 = arith.truncf %44 : vector<16x32xf32> to vector<16x32xbf16>
    %c0_24 = arith.constant 0 : index
    %c0_25 = arith.constant 0 : index
    %c0_26 = arith.constant 0 : index
    %c0_27 = arith.constant 0 : index
    %46 = vector.load %arg6[%c0_24, %c0_25, %c0_26, %c0_27] : memref<1x2x32x32xbf16, #tpu.memory_space<vmem>>, vector<1x1x32x32xbf16>
    %47 = vector.shape_cast %46 : vector<1x1x32x32xbf16> to vector<32x32xbf16>
    %cst_28 = arith.constant dense<0.000000e+00> : vector<16x32xf32>
    %48 = tpu.matmul %45, %47, %cst_28 {dimension_numbers = #tpu.dot_dimension_numbers<[1], [0], [0], [1], [0, 0, 1, 1], [], []>} : vector<16x32xbf16>, vector<32x32xbf16>, vector<16x32xf32> -> vector<16x32xf32>
    %c0_29 = arith.constant 0 : index
    %c0_30 = arith.constant 0 : index
    %c0_31 = arith.constant 0 : index
    %c0_32 = arith.constant 0 : index
    %49 = vector.load %arg9[%c0_29, %c0_30, %c0_31, %c0_32] : memref<1x5x1x32xf32, #tpu.memory_space<vmem>>, vector<1x1x1x32xf32>
    %50 = vector.shape_cast %49 : vector<1x1x1x32xf32> to vector<1x32xf32>
    %51 = vector.broadcast %50 : vector<1x32xf32> to vector<16x32xf32>
    %52 = arith.addf %48, %51 : vector<16x32xf32>
    %53 = arith.index_cast %arg1 : i32 to index
    %c8 = arith.constant 8 : index
    %54 = memref.load %arg2[%53, %c8] : memref<3x25xf32, #tpu.memory_space<smem>>
    %55 = vector.broadcast %54 : f32 to vector<16x32xf32>
    %56 = arith.mulf %55, %32 : vector<16x32xf32>
    %57 = arith.index_cast %arg1 : i32 to index
    %c9 = arith.constant 9 : index
    %58 = memref.load %arg2[%57, %c9] : memref<3x25xf32, #tpu.memory_space<smem>>
    %59 = vector.broadcast %58 : f32 to vector<16x32xf32>
    %60 = arith.mulf %59, %41 : vector<16x32xf32>
    %61 = arith.addf %56, %60 : vector<16x32xf32>
    %62 = arith.index_cast %arg1 : i32 to index
    %c10 = arith.constant 10 : index
    %63 = memref.load %arg2[%62, %c10] : memref<3x25xf32, #tpu.memory_space<smem>>
    %64 = vector.broadcast %63 : f32 to vector<16x32xf32>
    %65 = arith.mulf %64, %52 : vector<16x32xf32>
    %66 = arith.addf %61, %65 : vector<16x32xf32>
    %67 = arith.mulf %66, %5 : vector<16x32xf32>
    %68 = arith.index_cast %arg1 : i32 to index
    %c14 = arith.constant 14 : index
    %69 = memref.load %arg2[%68, %c14] : memref<3x25xf32, #tpu.memory_space<smem>>
    %70 = vector.broadcast %69 : f32 to vector<16x32xf32>
    %71 = arith.mulf %70, %67 : vector<16x32xf32>
    %72 = arith.index_cast %arg1 : i32 to index
    %c15 = arith.constant 15 : index
    %73 = memref.load %arg2[%72, %c15] : memref<3x25xf32, #tpu.memory_space<smem>>
    %cst_33 = arith.constant 0.000000e+00 : f32
    %74 = vector.broadcast %cst_33 : f32 to vector<16x32xf32>
    %75 = arith.maximumf %67, %74 : vector<16x32xf32>
    %76 = vector.broadcast %73 : f32 to vector<16x32xf32>
    %77 = arith.mulf %76, %75 : vector<16x32xf32>
    %78 = arith.addf %71, %77 : vector<16x32xf32>
    %79 = arith.index_cast %arg1 : i32 to index
    %c16 = arith.constant 16 : index
    %80 = memref.load %arg2[%79, %c16] : memref<3x25xf32, #tpu.memory_space<smem>>
    %81 = arith.negf %67 : vector<16x32xf32>
    %82 = math.exp %81 : vector<16x32xf32>
    %cst_34 = arith.constant 1.000000e+00 : f32
    %83 = vector.broadcast %cst_34 : f32 to vector<16x32xf32>
    %84 = arith.addf %83, %82 : vector<16x32xf32>
    %85 = arith.divf %83, %84 : vector<16x32xf32>
    %86 = vector.broadcast %80 : f32 to vector<16x32xf32>
    %87 = arith.mulf %86, %85 : vector<16x32xf32>
    %88 = arith.addf %78, %87 : vector<16x32xf32>
    %89 = arith.index_cast %arg1 : i32 to index
    %c4 = arith.constant 4 : index
    %90 = memref.load %arg2[%89, %c4] : memref<3x25xf32, #tpu.memory_space<smem>>
    %c0_35 = arith.constant 0 : index
    %c0_36 = arith.constant 0 : index
    %c0_37 = arith.constant 0 : index
    %91 = vector.load %arg11[%c0_35, %c0_36, %c0_37] : memref<5x16x32xf32, #tpu.memory_space<vmem>>, vector<1x16x32xf32>
    %92 = vector.shape_cast %91 : vector<1x16x32xf32> to vector<16x32xf32>
    %93 = vector.broadcast %90 : f32 to vector<16x32xf32>
    %94 = arith.mulf %93, %92 : vector<16x32xf32>
    %95 = arith.index_cast %arg1 : i32 to index
    %c5 = arith.constant 5 : index
    %96 = memref.load %arg2[%95, %c5] : memref<3x25xf32, #tpu.memory_space<smem>>
    %c1_38 = arith.constant 1 : index
    %c0_39 = arith.constant 0 : index
    %c0_40 = arith.constant 0 : index
    %97 = vector.load %arg11[%c1_38, %c0_39, %c0_40] : memref<5x16x32xf32, #tpu.memory_space<vmem>>, vector<1x16x32xf32>
    %98 = vector.shape_cast %97 : vector<1x16x32xf32> to vector<16x32xf32>
    %99 = vector.broadcast %96 : f32 to vector<16x32xf32>
    %100 = arith.mulf %99, %98 : vector<16x32xf32>
    %101 = arith.addf %94, %100 : vector<16x32xf32>
    %102 = arith.index_cast %arg1 : i32 to index
    %c6 = arith.constant 6 : index
    %103 = memref.load %arg2[%102, %c6] : memref<3x25xf32, #tpu.memory_space<smem>>
    %c2_41 = arith.constant 2 : index
    %c0_42 = arith.constant 0 : index
    %c0_43 = arith.constant 0 : index
    %104 = vector.load %arg11[%c2_41, %c0_42, %c0_43] : memref<5x16x32xf32, #tpu.memory_space<vmem>>, vector<1x16x32xf32>
    %105 = vector.shape_cast %104 : vector<1x16x32xf32> to vector<16x32xf32>
    %106 = vector.broadcast %103 : f32 to vector<16x32xf32>
    %107 = arith.mulf %106, %105 : vector<16x32xf32>
    %108 = arith.addf %101, %107 : vector<16x32xf32>
    %109 = arith.index_cast %arg1 : i32 to index
    %c7 = arith.constant 7 : index
    %110 = memref.load %arg2[%109, %c7] : memref<3x25xf32, #tpu.memory_space<smem>>
    %c3_44 = arith.constant 3 : index
    %c0_45 = arith.constant 0 : index
    %c0_46 = arith.constant 0 : index
    %111 = vector.load %arg11[%c3_44, %c0_45, %c0_46] : memref<5x16x32xf32, #tpu.memory_space<vmem>>, vector<1x16x32xf32>
    %112 = vector.shape_cast %111 : vector<1x16x32xf32> to vector<16x32xf32>
    %113 = vector.broadcast %110 : f32 to vector<16x32xf32>
    %114 = arith.mulf %113, %112 : vector<16x32xf32>
    %115 = arith.addf %108, %114 : vector<16x32xf32>
    %116 = arith.truncf %115 : vector<16x32xf32> to vector<16x32xbf16>
    %c0_47 = arith.constant 0 : index
    %c1_48 = arith.constant 1 : index
    %c0_49 = arith.constant 0 : index
    %c0_50 = arith.constant 0 : index
    %117 = vector.load %arg5[%c0_47, %c1_48, %c0_49, %c0_50] : memref<1x2x32x64xbf16, #tpu.memory_space<vmem>>, vector<1x1x32x64xbf16>
    %118 = vector.shape_cast %117 : vector<1x1x32x64xbf16> to vector<32x64xbf16>
    %cst_51 = arith.constant dense<0.000000e+00> : vector<16x64xf32>
    %119 = tpu.matmul %116, %118, %cst_51 {dimension_numbers = #tpu.dot_dimension_numbers<[1], [0], [0], [1], [0, 0, 1, 1], [], []>} : vector<16x32xbf16>, vector<32x64xbf16>, vector<16x64xf32> -> vector<16x64xf32>
    %c0_52 = arith.constant 0 : index
    %c1_53 = arith.constant 1 : index
    %c0_54 = arith.constant 0 : index
    %c0_55 = arith.constant 0 : index
    %120 = vector.load %arg8[%c0_52, %c1_53, %c0_54, %c0_55] : memref<1x2x1x64xf32, #tpu.memory_space<vmem>>, vector<1x1x1x64xf32>
    %121 = vector.shape_cast %120 : vector<1x1x1x64xf32> to vector<1x64xf32>
    %122 = vector.broadcast %121 : vector<1x64xf32> to vector<16x64xf32>
    %123 = arith.addf %119, %122 : vector<16x64xf32>
    %124 = vector.extract_strided_slice %123 {offsets = [0, 0], sizes = [16, 32], strides = [1, 1]} : vector<16x64xf32> to vector<16x32xf32>
    %125 = vector.extract_strided_slice %123 {offsets = [0, 32], sizes = [16, 32], strides = [1, 1]} : vector<16x64xf32> to vector<16x32xf32>
    %cst_56 = arith.constant 0.000000e+00 : f32
    %126 = vector.broadcast %cst_56 : f32 to vector<16x32xf32>
    %127 = arith.maximumf %125, %126 : vector<16x32xf32>
    %128 = arith.truncf %127 : vector<16x32xf32> to vector<16x32xbf16>
    %c0_57 = arith.constant 0 : index
    %c1_58 = arith.constant 1 : index
    %c0_59 = arith.constant 0 : index
    %c0_60 = arith.constant 0 : index
    %129 = vector.load %arg6[%c0_57, %c1_58, %c0_59, %c0_60] : memref<1x2x32x32xbf16, #tpu.memory_space<vmem>>, vector<1x1x32x32xbf16>
    %130 = vector.shape_cast %129 : vector<1x1x32x32xbf16> to vector<32x32xbf16>
    %cst_61 = arith.constant dense<0.000000e+00> : vector<16x32xf32>
    %131 = tpu.matmul %128, %130, %cst_61 {dimension_numbers = #tpu.dot_dimension_numbers<[1], [0], [0], [1], [0, 0, 1, 1], [], []>} : vector<16x32xbf16>, vector<32x32xbf16>, vector<16x32xf32> -> vector<16x32xf32>
    %c0_62 = arith.constant 0 : index
    %c1_63 = arith.constant 1 : index
    %c0_64 = arith.constant 0 : index
    %c0_65 = arith.constant 0 : index
    %132 = vector.load %arg9[%c0_62, %c1_63, %c0_64, %c0_65] : memref<1x5x1x32xf32, #tpu.memory_space<vmem>>, vector<1x1x1x32xf32>
    %133 = vector.shape_cast %132 : vector<1x1x1x32xf32> to vector<1x32xf32>
    %134 = vector.broadcast %133 : vector<1x32xf32> to vector<16x32xf32>
    %135 = arith.addf %131, %134 : vector<16x32xf32>
    %136 = arith.index_cast %arg1 : i32 to index
    %c11 = arith.constant 11 : index
    %137 = memref.load %arg2[%136, %c11] : memref<3x25xf32, #tpu.memory_space<smem>>
    %138 = vector.broadcast %137 : f32 to vector<16x32xf32>
    %139 = arith.mulf %138, %115 : vector<16x32xf32>
    %140 = arith.index_cast %arg1 : i32 to index
    %c12 = arith.constant 12 : index
    %141 = memref.load %arg2[%140, %c12] : memref<3x25xf32, #tpu.memory_space<smem>>
    %142 = vector.broadcast %141 : f32 to vector<16x32xf32>
    %143 = arith.mulf %142, %124 : vector<16x32xf32>
    %144 = arith.addf %139, %143 : vector<16x32xf32>
    %145 = arith.index_cast %arg1 : i32 to index
    %c13 = arith.constant 13 : index
    %146 = memref.load %arg2[%145, %c13] : memref<3x25xf32, #tpu.memory_space<smem>>
    %147 = vector.broadcast %146 : f32 to vector<16x32xf32>
    %148 = arith.mulf %147, %135 : vector<16x32xf32>
    %149 = arith.addf %144, %148 : vector<16x32xf32>
    %150 = arith.mulf %149, %5 : vector<16x32xf32>
    %151 = arith.index_cast %arg1 : i32 to index
    %c17 = arith.constant 17 : index
    %152 = memref.load %arg2[%151, %c17] : memref<3x25xf32, #tpu.memory_space<smem>>
    %153 = vector.broadcast %152 : f32 to vector<16x32xf32>
    %154 = arith.mulf %153, %150 : vector<16x32xf32>
    %155 = arith.index_cast %arg1 : i32 to index
    %c18 = arith.constant 18 : index
    %156 = memref.load %arg2[%155, %c18] : memref<3x25xf32, #tpu.memory_space<smem>>
    %cst_66 = arith.constant 0.000000e+00 : f32
    %157 = vector.broadcast %cst_66 : f32 to vector<16x32xf32>
    %158 = arith.maximumf %150, %157 : vector<16x32xf32>
    %159 = vector.broadcast %156 : f32 to vector<16x32xf32>
    %160 = arith.mulf %159, %158 : vector<16x32xf32>
    %161 = arith.addf %154, %160 : vector<16x32xf32>
    %162 = arith.index_cast %arg1 : i32 to index
    %c19 = arith.constant 19 : index
    %163 = memref.load %arg2[%162, %c19] : memref<3x25xf32, #tpu.memory_space<smem>>
    %164 = arith.negf %150 : vector<16x32xf32>
    %165 = math.exp %164 : vector<16x32xf32>
    %cst_67 = arith.constant 1.000000e+00 : f32
    %166 = vector.broadcast %cst_67 : f32 to vector<16x32xf32>
    %167 = arith.addf %166, %165 : vector<16x32xf32>
    %168 = arith.divf %166, %167 : vector<16x32xf32>
    %169 = vector.broadcast %163 : f32 to vector<16x32xf32>
    %170 = arith.mulf %169, %168 : vector<16x32xf32>
    %171 = arith.addf %161, %170 : vector<16x32xf32>
    %172 = tpu.concatenate %88, %171 in 1 : vector<16x32xf32>, vector<16x32xf32> -> vector<16x64xf32>
    %173 = arith.truncf %172 : vector<16x64xf32> to vector<16x64xbf16>
    %c0_68 = arith.constant 0 : index
    %c0_69 = arith.constant 0 : index
    %c0_70 = arith.constant 0 : index
    %174 = vector.load %arg7[%c0_68, %c0_69, %c0_70] : memref<1x64x32xbf16, #tpu.memory_space<vmem>>, vector<1x64x32xbf16>
    %175 = vector.shape_cast %174 : vector<1x64x32xbf16> to vector<64x32xbf16>
    %cst_71 = arith.constant dense<0.000000e+00> : vector<16x32xf32>
    %176 = tpu.matmul %173, %175, %cst_71 {dimension_numbers = #tpu.dot_dimension_numbers<[1], [0], [0], [1], [0, 0, 1, 1], [], []>} : vector<16x64xbf16>, vector<64x32xbf16>, vector<16x32xf32> -> vector<16x32xf32>
    %c0_72 = arith.constant 0 : index
    %c2_73 = arith.constant 2 : index
    %c0_74 = arith.constant 0 : index
    %c0_75 = arith.constant 0 : index
    %177 = vector.load %arg9[%c0_72, %c2_73, %c0_74, %c0_75] : memref<1x5x1x32xf32, #tpu.memory_space<vmem>>, vector<1x1x1x32xf32>
    %178 = vector.shape_cast %177 : vector<1x1x1x32xf32> to vector<1x32xf32>
    %179 = vector.broadcast %178 : vector<1x32xf32> to vector<16x32xf32>
    %180 = arith.addf %176, %179 : vector<16x32xf32>
    %181 = arith.index_cast %arg1 : i32 to index
    %c20 = arith.constant 20 : index
    %182 = memref.load %arg2[%181, %c20] : memref<3x25xf32, #tpu.memory_space<smem>>
    %183 = arith.addf %88, %171 : vector<16x32xf32>
    %184 = vector.broadcast %182 : f32 to vector<16x32xf32>
    %185 = arith.mulf %184, %183 : vector<16x32xf32>
    %186 = arith.index_cast %arg1 : i32 to index
    %c21 = arith.constant 21 : index
    %187 = memref.load %arg2[%186, %c21] : memref<3x25xf32, #tpu.memory_space<smem>>
    %188 = arith.mulf %88, %171 : vector<16x32xf32>
    %189 = vector.broadcast %187 : f32 to vector<16x32xf32>
    %190 = arith.mulf %189, %188 : vector<16x32xf32>
    %191 = arith.addf %185, %190 : vector<16x32xf32>
    %192 = arith.index_cast %arg1 : i32 to index
    %c22 = arith.constant 22 : index
    %193 = memref.load %arg2[%192, %c22] : memref<3x25xf32, #tpu.memory_space<smem>>
    %194 = vector.broadcast %193 : f32 to vector<16x32xf32>
    %195 = arith.mulf %194, %180 : vector<16x32xf32>
    %196 = arith.addf %191, %195 : vector<16x32xf32>
    %cst_76 = arith.constant dense<0.000000e+00> : vector<16xf32>
    %197 = vector.multi_reduction <add>, %196, %cst_76 [1] : vector<16x32xf32> to vector<16xf32>
    %198 = vector.shape_cast %197 : vector<16xf32> to vector<16x1xf32>
    %cst_77 = arith.constant 3.125000e-02 : f32
    %199 = vector.broadcast %cst_77 : f32 to vector<16x1xf32>
    %200 = arith.mulf %198, %199 : vector<16x1xf32>
    %201 = arith.mulf %196, %196 : vector<16x32xf32>
    %cst_78 = arith.constant dense<0.000000e+00> : vector<16xf32>
    %202 = vector.multi_reduction <add>, %201, %cst_78 [1] : vector<16x32xf32> to vector<16xf32>
    %203 = vector.shape_cast %202 : vector<16xf32> to vector<16x1xf32>
    %cst_79 = arith.constant 3.125000e-02 : f32
    %204 = vector.broadcast %cst_79 : f32 to vector<16x1xf32>
    %205 = arith.mulf %203, %204 : vector<16x1xf32>
    %206 = arith.mulf %200, %200 : vector<16x1xf32>
    %207 = arith.subf %205, %206 : vector<16x1xf32>
    %cst_80 = arith.constant 0.000000e+00 : f32
    %208 = vector.broadcast %cst_80 : f32 to vector<16x1xf32>
    %209 = arith.maximumf %207, %208 : vector<16x1xf32>
    %210 = vector.broadcast %200 : vector<16x1xf32> to vector<16x32xf32>
    %211 = arith.subf %196, %210 : vector<16x32xf32>
    %cst_81 = arith.constant 9.99999974E-6 : f32
    %212 = vector.broadcast %cst_81 : f32 to vector<16x1xf32>
    %213 = arith.addf %209, %212 : vector<16x1xf32>
    %214 = math.rsqrt %213 : vector<16x1xf32>
    %215 = vector.broadcast %214 : vector<16x1xf32> to vector<16x32xf32>
    %216 = arith.mulf %211, %215 : vector<16x32xf32>
    %c0_82 = arith.constant 0 : index
    %c3_83 = arith.constant 3 : index
    %c0_84 = arith.constant 0 : index
    %c0_85 = arith.constant 0 : index
    %217 = vector.load %arg9[%c0_82, %c3_83, %c0_84, %c0_85] : memref<1x5x1x32xf32, #tpu.memory_space<vmem>>, vector<1x1x1x32xf32>
    %218 = vector.shape_cast %217 : vector<1x1x1x32xf32> to vector<1x32xf32>
    %219 = vector.broadcast %218 : vector<1x32xf32> to vector<16x32xf32>
    %220 = arith.mulf %216, %219 : vector<16x32xf32>
    %c0_86 = arith.constant 0 : index
    %c4_87 = arith.constant 4 : index
    %c0_88 = arith.constant 0 : index
    %c0_89 = arith.constant 0 : index
    %221 = vector.load %arg9[%c0_86, %c4_87, %c0_88, %c0_89] : memref<1x5x1x32xf32, #tpu.memory_space<vmem>>, vector<1x1x1x32xf32>
    %222 = vector.shape_cast %221 : vector<1x1x1x32xf32> to vector<1x32xf32>
    %223 = vector.broadcast %222 : vector<1x32xf32> to vector<16x32xf32>
    %224 = arith.addf %220, %223 : vector<16x32xf32>
    %225 = arith.index_cast %arg1 : i32 to index
    %c23 = arith.constant 23 : index
    %226 = memref.load %arg2[%225, %c23] : memref<3x25xf32, #tpu.memory_space<smem>>
    %227 = vector.broadcast %226 : f32 to vector<16x32xf32>
    %228 = arith.mulf %227, %224 : vector<16x32xf32>
    %229 = arith.index_cast %arg1 : i32 to index
    %c24 = arith.constant 24 : index
    %230 = memref.load %arg2[%229, %c24] : memref<3x25xf32, #tpu.memory_space<smem>>
    %231 = vector.broadcast %230 : f32 to vector<16x32xf32>
    %232 = arith.mulf %231, %196 : vector<16x32xf32>
    %233 = arith.addf %228, %232 : vector<16x32xf32>
    %c2_i32 = arith.constant 2 : i32
    %234 = arith.addi %c2_i32, %arg1 : i32
    %235 = arith.index_cast %234 : i32 to index
    %c0_90 = arith.constant 0 : index
    %c0_91 = arith.constant 0 : index
    %236 = vector.load %arg11[%235, %c0_90, %c0_91] : memref<5x16x32xf32, #tpu.memory_space<vmem>>, vector<1x16x32xf32>
    %237 = vector.shape_cast %236 : vector<1x16x32xf32> to vector<16x32xf32>
    %238 = vector.shape_cast %233 : vector<16x32xf32> to vector<1x16x32xf32>
    tpu.vector_store %arg11[%235, %c0_90, %c0_91], %238 {strides = array<i32>} : memref<5x16x32xf32, #tpu.memory_space<vmem>>, vector<1x16x32xf32>,
    %c2_i32_92 = arith.constant 2 : i32
    %239 = arith.cmpi eq, %arg1, %c2_i32_92 : i32
    %240 = arith.extui %239 : i1 to i32
    %c0_i32_93 = arith.constant 0 : i32
    %241 = arith.cmpi ne, %240, %c0_i32_93 : i32
    scf.if %241 {
      %c0_94 = arith.constant 0 : index
      %c0_95 = arith.constant 0 : index
      %242 = vector.load %arg10[%c0_94, %c0_95] : memref<16x32xf32, #tpu.memory_space<vmem>>, vector<16x32xf32>
      tpu.vector_store %arg10[%c0_94, %c0_95], %233 {strides = array<i32>} : memref<16x32xf32, #tpu.memory_space<vmem>>, vector<16x32xf32>,
    } else {
    }
    return
  }
  func.func @transform_0(%arg0: i32, %arg1: i32) -> (i32, i32) {
    %c0_i32 = arith.constant 0 : i32
    %c0_i32_0 = arith.constant 0 : i32
    %c0_i32_1 = arith.constant 0 : i32
    return %c0_i32, %c0_i32_0 : i32, i32
  }
  func.func @transform_1(%arg0: i32, %arg1: i32) -> (i32, i32, i32) {
    %c0_i32 = arith.constant 0 : i32
    %c0_i32_0 = arith.constant 0 : i32
    %c0_i32_1 = arith.constant 0 : i32
    return %c0_i32, %arg0, %c0_i32_0 : i32, i32, i32
  }
  func.func @transform_2(%arg0: i32, %arg1: i32) -> (i32, i32) {
    %c0_i32 = arith.constant 0 : i32
    %c0_i32_0 = arith.constant 0 : i32
    return %arg0, %c0_i32 : i32, i32
  }
  func.func @transform_3(%arg0: i32, %arg1: i32) -> (i32, i32, i32, i32) {
    %c0_i32 = arith.constant 0 : i32
    %c0_i32_0 = arith.constant 0 : i32
    %c0_i32_1 = arith.constant 0 : i32
    %c0_i32_2 = arith.constant 0 : i32
    return %arg1, %c0_i32, %c0_i32_0, %c0_i32_1 : i32, i32, i32, i32
  }
  func.func @transform_4(%arg0: i32, %arg1: i32) -> (i32, i32, i32, i32) {
    %c0_i32 = arith.constant 0 : i32
    %c0_i32_0 = arith.constant 0 : i32
    %c0_i32_1 = arith.constant 0 : i32
    %c0_i32_2 = arith.constant 0 : i32
    return %arg1, %c0_i32, %c0_i32_0, %c0_i32_1 : i32, i32, i32, i32
  }
  func.func @transform_5(%arg0: i32, %arg1: i32) -> (i32, i32, i32) {
    %c0_i32 = arith.constant 0 : i32
    %c0_i32_0 = arith.constant 0 : i32
    %c0_i32_1 = arith.constant 0 : i32
    return %arg1, %c0_i32, %c0_i32_0 : i32, i32, i32
  }
  func.func @transform_6(%arg0: i32, %arg1: i32) -> (i32, i32, i32, i32) {
    %c0_i32 = arith.constant 0 : i32
    %c0_i32_0 = arith.constant 0 : i32
    %c0_i32_1 = arith.constant 0 : i32
    %c0_i32_2 = arith.constant 0 : i32
    return %arg1, %c0_i32, %c0_i32_0, %c0_i32_1 : i32, i32, i32, i32
  }
  func.func @transform_7(%arg0: i32, %arg1: i32) -> (i32, i32, i32, i32) {
    %c0_i32 = arith.constant 0 : i32
    %c0_i32_0 = arith.constant 0 : i32
    %c0_i32_1 = arith.constant 0 : i32
    %c0_i32_2 = arith.constant 0 : i32
    return %arg1, %c0_i32, %c0_i32_0, %c0_i32_1 : i32, i32, i32, i32
  }
  func.func @transform_8(%arg0: i32, %arg1: i32) -> (i32, i32) {
    %c0_i32 = arith.constant 0 : i32
    %c0_i32_0 = arith.constant 0 : i32
    return %arg0, %c0_i32 : i32, i32
  }
}

</mosaic_0001>

<bundles_post_ra>
// kernel: tpu_custom_call.1
= control target key start
LH: loop header
LB: loop body
LE: loop exit
PB: predicated region body
PF: predicated region fallthrough
CT: control target
= control target key end

     0   :  { %s1994_s0 = inlined_call_operand.vmem [shape: f32[3,25], index: 0, kind: input, shape index: {}]   ;;  %s1995_s1 = inlined_call_operand.vmem [shape: f32[2,16,32], index: 1, kind: input, shape index: {}]   ;;  %s1996_s2 = inlined_call_operand.vmem [shape: f32[16,1], index: 2, kind: input, shape index: {}]   ;;  %s1997_s3 = inlined_call_operand.vmem [shape: bf16[3,2,32,64], index: 3, kind: input, shape index: {}]   ;;  %s1998_s4 = inlined_call_operand.hbm [shape: bf16[3,2,32,32], index: 4, kind: input, shape index: {}]   ;;  %s1999_s5 = inlined_call_operand.vmem [shape: bf16[3,64,32], index: 5, kind: input, shape index: {}]   ;;  %s2000_s6 = inlined_call_operand.vmem [shape: f32[3,2,1,64], index: 6, kind: input, shape index: {}]   ;;  %s2001_s7 = inlined_call_operand.vmem [shape: f32[3,5,1,32], index: 7, kind: input, shape index: {}]   ;;  %s2002_s8 = inlined_call_operand.hbm [shape: f32[16,32], index: 8, kind: output, shape index: {}]  }
   0x1   :  { %2005 = sst [smem:[#allocation13_spill]] %s1994_s0 }
   0x2   :  { %2006 = sst [smem:[#allocation14_spill]] %s2002_s8 }
   0x3   :  { %13 = vsyncpa [#allocation6], 0 }
   0x4   :  { %14 = vsyncpa [#allocation4], 0 }
   0x5   :  { %16 = vsyncpa [#allocation4 + $0x1], 0 }
   0x6   :  { %17 = vsyncpa [#allocation5], 0  ;;  %s1650_s27 = smov 0   ;;  %s1652_s28 = smov 0  }
   0x7   :  { %s1654_s29 = smov 0   ;;  %s1656_s30 = smov 0  }
   0x8   :  { %s1658_s9 = smov 0   ;;  %s1660_s10 = smov 0  }
   0x9 LB: > { %2007 = sst [smem:[#allocation12_spill]] %s1593_s10  ;;  %s2003_s11 = sadd.s32 4294967295, %s1593_s10   ;;  %s1593_s10 = sphi %s1660_s10, %s23_s10   ;;  %s1589_s9 = sphi %s1658_s9, %s2024_s9   ;;  %s1585_s30 = sphi %s1656_s30, %s2023_s30   ;;  %s1581_s29 = sphi %s1654_s29, %s2022_s29   ;;  %s1577_s28 = sphi %s1652_s28, %s2021_s28   ;;  %s1573_s27 = sphi %s1650_s27, %s2020_s27  }
   0xa   : > { %p148_p0 = scmp.ne.s32.totalorder %s1581_s29, %s1577_s28  ;;  %p149_p1 = scmp.eq.s32.totalorder %s1593_s10, 0 }
   0xb   : > { %p154_p2 = scmp.ne.s32.totalorder %s1577_s28, %s1573_s27  ;;  %p1686_p3 = scmp.eq.s32.totalorder %s2003_s11, 0 }
   0xc   : > { %p150_p4 = por %p149_p1, %p148_p0  ;;  %p1233_p5 = scmp.ge.s32.totalorder %s1593_s10, 1 }
   0xd   : > { %p1693_p6 = por %p1686_p3, %p154_p2  ;;  %p269_p7 = scmp.lt.s32.totalorder %s1593_s10, 4 }
   0xe   : > { %s2010_s0 = sld [smem:[#allocation13_spill]]  ;;  %p1366_p10 = scmp.lt.s32.totalorder %s1593_s10, 3 }
   0xf   : > { %p1701_p8 = pnand %p1233_p5, %p269_p7  ;;  %s318_s19 = sand.u32 1, %s1581_s29  }
  0x10   : > { %p1711_p12 = pnand %p1366_p10, %p150_p4  ;;  %s1595_s21 = smov [#allocation3]  }
  0x11   : > { %p1357_p9 = pneg %p1701_p8  ;;  %s32_s22 = sadd.s32 1, %s1589_s9 }
  0x12   : > { %s1238_s23 = sshll.u32 %s318_s19, 5  ;;  %p33_p13 = scmp.ge.s32.totalorder %s32_s22, 3 }
  0x13   : > { %p1358_p11 = pnand %p1357_p9, %p1686_p3  ;;  %s1331_s24 = sshll.u32 %s1589_s9, 5 }
  0x14   : > { %s281_s17 = sshll.u32 %s2010_s0, 4  ;;  %s322_s25 = scalar_lea.vmem [#allocation7], %s1238_s23  ;;  %s282_s17 = int_to_ptr.vmem [resolvable:$true] %s281_s17 }
  0x15   : > { %1360 = dma.vmem_to_smem (!%p1358_p11), %s282_s17, 64, %s1595_s21, [#allocation6]  }
  0x16   : > { %s330_s26 = sshll.u32 %s322_s25, 4  ;;  %s2026_s22 = smov (%p33_p13, %s32_s22), 0  ;;  %s331_s26 = int_to_ptr.vmem [resolvable:$true] %s330_s26 }
  0x17   : > { %s327_s16 = scalar_lea.hbm %s1998_s4, %s1331_s24  ;;  %s138_s11 = ssub.s32 %s1589_s9, %s2026_s22 }
  0x18   : > { %s328_s12 = sshll.u32 %s327_s16, 4  ;;  %p139_p0 = scmp.eq.s32.totalorder %s138_s11, 0  ;;  %s329_s12 = int_to_ptr.hbm [resolvable:$true] %s328_s12 }
  0x19   : > { %s2013_s17 = sadd.s32 1, %s1581_s29  ;;  %s319_s0 = scalar_lea.sflag [#allocation4], %s318_s19 }
  0x1a   : > { %s1727_s21 = scalar_select %p139_p0, %s1581_s29, %s2013_s17  }
  0x1b   : > { %s1596_s8 = smov 64   ;;  %s1597_s10 = smov 4  }
  0x1c   : > { %1364 = dma.hbm_to_vmem [thread:$0]  (!%p1711_p12), %s329_s12, 512, %s331_s26, %s319_s0, %s1596_s8, %s1596_s8, %s1597_s10  }
  0x1d   : > { %364 = sbr.rel (%p1701_p8) target bundleno = 933 (0x3a5), region = 52 }
  0x22   : > { %1560 = dma.done.wait (%p1686_p3), [#allocation6], 64  }
  0x23   : > { %1562 = vsyncadd (%p1686_p3), [#allocation6], 4294967232  ;;  %s371_s11 = sand.u32 1, %s1577_s28  }
  0x24   : > { %s1243_s23 = sshll.u32 %s371_s11, 5  ;;  %s372_s24 = scalar_lea.sflag [#allocation4], %s371_s11 }
  0x25   : > { %s1738_s25 = scalar_lea.vmem [#allocation7], %s1243_s23 }
  0x26   : > { %1564 = dma.done.wait (%p1693_p6), %s372_s24, 512  }
  0x27   : > { %1566 = vsyncadd (%p1693_p6), %s372_s24, 4294966784 }
  0x28   : > { %381 = sfence }
  0x29   : > { %p445_p1 = scmp.lt.s32.totalorder %s1585_s30, 2  ;;  %p1249_p2 = scmp.ne.s32.totalorder %s1585_s30, 0 }
  0x2b   : > { %s446_s0 = scalar_select %p445_p1, %s1585_s30, 2 }
  0x2d   : > { %s1332_s8 = sshll.u32 %s446_s0, 5  ;;  %s1248_s10 = sshll.u32 %s446_s0, 1 }
  0x2e   : > { %s1749_s18 = scalar_lea.vmem %s1997_s3, %s1332_s8  ;;  %s1754_s26 = scalar_lea.vmem %s1999_s5, %s1332_s8 }
  0x2f   : > { %s1759_s15 = scalar_lea.vmem %s2000_s6, %s1248_s10  ;;  %s1346_s16 = smul.u32 5, %s446_s0 }
  0x30   : > { %468 = sbr.rel (%p1249_p2) target bundleno = 62 (0x3e), region = 64 }
  0x31   : > { %s1764_s23 = scalar_lea.vmem %s2001_s7, %s1346_s16 }
  0x35   : > { %v469_v0 = vld [vmem:[%s1995_s1] sm:$0xff]  ;;  %vm471_vm0 = vcmask 261120   ;;  %v470_v1 = vld [vmem:[%s1995_s1 + $0x8] sm:$0xff]  ;;  %v1250_v2 = vld [vmem:[%s1995_s1 + $0x10] sm:$0xff]  ;;  %v1598_v4 = vmov 0.0  }
  0x36   : > { %472 = vst.msk [vmem:[#allocation2] sm:$0xff] %vm471_vm0, %v469_v0  ;;  %v1251_v3 = vld [vmem:[%s1995_s1 + $0x18] sm:$0xff] }
  0x37   : > { %473 = vst.msk [vmem:[#allocation2 + $0x8] sm:$0xff] %vm471_vm0, %v470_v1 }
  0x38   : > { %478 = vst.msk [vmem:[#allocation2 + $0x10] sm:$0xff] %vm471_vm0, %v1250_v2 }
  0x39   : > { %479 = vst.msk [vmem:[#allocation2 + $0x18] sm:$0xff] %vm471_vm0, %v1251_v3 }
  0x3a   : > { %481 = vst.msk [vmem:[#allocation2 + $0x20] sm:$0xff] %vm471_vm0, %v1598_v4 }
  0x3b   : > { %482 = vst.msk [vmem:[#allocation2 + $0x28] sm:$0xff] %vm471_vm0, %v1598_v4 }
  0x3c   : > { %484 = vst.msk [vmem:[#allocation2 + $0x30] sm:$0xff] %vm471_vm0, %v1598_v4 }
  0x3d   : > { %485 = vst.msk [vmem:[#allocation2 + $0x38] sm:$0xff] %vm471_vm0, %v1598_v4 }
  0x3e PF: > { %v1339_v5 = vld [vmem:[%s1749_s18 + $0x18] sm:$0xff]  ;;  %s1781_s27 = sshll.u32 %s1585_s30, 7  ;;  %v1338_v6 = vld [vmem:[%s1749_s18 + $0x10] sm:$0xff]  ;;  %v1335_v7 = vld [vmem:[%s1749_s18 + $0x8] sm:$0xff]  ;;  %vm556_vm1 = vcmask 261120   ;;  %p1326_p3 = scmp.ne.s32.totalorder %s1585_s30, 2 }
  0x3f   : > { %s697_s14 = sadd.s32 4, %s1781_s27  ;;  %s702_s16 = sadd.s32 5, %s1781_s27  ;;  %755 = vmatpush.bf16.msra.mxu2 %v1339_v5  ;;  %v500_v8 = vld [vmem:[#allocation2] sm:$0xff]  ;;  %v501_v9 = vld [vmem:[#allocation2 + $0x8] sm:$0xff]  ;;  %v508_v11 = vld [vmem:[#allocation2 + $0x10] sm:$0xff]  ;;  %566 = vmatpush.bf16.msra.mxu0 %v1335_v7 }
  0x40   : > { %s698_s17 = sld [smem:[#allocation3 + %s697_s14]]  ;;  %s709_s11 = sadd.s32 6, %s1781_s27  ;;  %v1334_v10 = vld [vmem:[%s1749_s18] sm:$0xff]  ;;  %v509_v12 = vld [vmem:[#allocation2 + $0x18] sm:$0xff]  ;;  %v1341_v55 = vld [vmem:[%s1738_s25 + $0x18] sm:$0xff] }
  0x41   : > { %s703_s24 = sld [smem:[#allocation3 + %s702_s16]]  ;;  %s716_s12 = sadd.s32 7, %s1781_s27  ;;  %v518_v13 = vld [vmem:[#allocation2 + $0x20] sm:$0xff]  ;;  %800 = vmatpush.bf16.msra.mxu3 %v1341_v55  ;;  %v1345_v55 = vld [vmem:[%s1754_s26 + $0x18] sm:$0xff] }
  0x42   : > { %s710_s8 = sld [smem:[#allocation3 + %s709_s11]]  ;;  %s505_s13 = sadd.s32 1, %s1781_s27  ;;  %v519_v14 = vld [vmem:[#allocation2 + $0x28] sm:$0xff]  ;;  %v1340_v56 = vld [vmem:[%s1738_s25 + $0x10] sm:$0xff] }
  0x43   : > { %s717_s10 = sld [smem:[#allocation3 + %s716_s12]]  ;;  %s515_s19 = sadd.s32 2, %s1781_s27  ;;  %756 = vmatpush.bf16.msra.mxu2 %v1338_v6  ;;  %v528_v16 = vld [vmem:[#allocation2 + $0x30] sm:$0xff]  ;;  %567 = vmatpush.bf16.msra.mxu0 %v1334_v10  ;;  %v1435_v59 = vld [vmem:[%s1759_s15 + $0x1] ss:$0 sm:$0xff] }
  0x44   : > { %s1793_s0 = sld [smem:[#allocation3 + %s1781_s27]]  ;;  %s525_s20 = sadd.s32 3, %s1781_s27  ;;  %v529_v17 = vld [vmem:[#allocation2 + $0x38] sm:$0xff]  ;;  %v1436_v61 = vld [vmem:[%s1759_s15] ss:$0 sm:$0xff]  ;;  %v1336_v10 = vld [vmem:[%s1738_s25] sm:$0xff] }
  0x45   : > { %s506_s14 = sld [smem:[#allocation3 + %s505_s13]]  ;;  %801 = vmatpush.bf16.msra.mxu3 %v1340_v56  ;;  %s617_s13 = sadd.s32 8, %s1781_s27  ;;  %v1344_v56 = vld [vmem:[%s1754_s26 + $0x10] sm:$0xff] }
  0x46   : > { %v699_v15 = vstv %s698_s17  ;;  %s1796_s16 = sld [smem:[#allocation3 + %s515_s19]]  ;;  %s1599_s17 = smov 96  }
  0x47   : > { %v700_v18 = vmul.f32 %v699_v15, %v500_v8  ;;  %v701_v19 = vmul.f32 %v699_v15, %v501_v9  ;;  %v704_v20 = vstv %s703_s24  ;;  %s526_s18 = sld [smem:[#allocation3 + %s525_s20]]  ;;  %s622_s19 = sadd.s32 9, %s1781_s27  ;;  %944 = vmatpush.bf16.msrb.mxu0 %v1345_v55 }
  0x48   : > { %v705_v21 = vmul.f32 %v704_v20, %v508_v11  ;;  %v706_v22 = vmul.f32 %v704_v20, %v509_v12  ;;  %v711_v23 = vstv %s710_s8  ;;  %s813_s8 = sadd.s32 12, %s1781_s27  ;;  %s1842_s20 = sld [smem:[#allocation3 + %s617_s13]] }
  0x49   : > { %v712_v24 = vmul.f32 %v711_v23, %v518_v13  ;;  %v713_v25 = vmul.f32 %v711_v23, %v519_v14  ;;  %v718_v26 = vstv %s717_s10  ;;  %v1859_v23 = vld [vmem:[%s1764_s23] ss:$0 sm:$0xff]  ;;  %s829_s11 = sadd.s32 17, %s1781_s27  ;;  %s834_s24 = sadd.s32 18, %s1781_s27 }
  0x4a   : > { %v707_v27 = vadd.f32 %v705_v21, %v700_v18  ;;  %v708_v28 = vadd.f32 %v706_v22, %v701_v19  ;;  %v719_v29 = vmul.f32 %v718_v26, %v528_v16  ;;  %v720_v30 = vmul.f32 %v718_v26, %v529_v17  ;;  %v1437_v18 = vld [vmem:[%s1764_s23 + $0x1] ss:$0 sm:$0xff]  ;;  %s1886_s12 = sld [smem:[#allocation3 + %s829_s11]] }
  0x4b   : > { %v502_v31 = vstv %s1793_s0  ;;  %v510_v32 = vstv %s506_s14  ;;  %s1840_s0 = sld [smem:[#allocation3 + %s813_s8]]  ;;  %s820_s14 = sadd.s32 13, %s1781_s27  ;;  %945 = vmatpush.bf16.msrb.mxu0 %v1344_v56 }
  0x4c   : > { %v714_v33 = vadd.f32 %v712_v24, %v707_v27  ;;  %v715_v34 = vadd.f32 %v713_v25, %v708_v28  ;;  %v503_v35 = vmul.f32 %v502_v31, %v500_v8  ;;  %v504_v36 = vmul.f32 %v502_v31, %v501_v9  ;;  %v1337_v9 = vld [vmem:[%s1738_s25 + $0x8] sm:$0xff]  ;;  %s808_s25 = sadd.s32 11, %s1781_s27  ;;  %s835_s8 = sld [smem:[#allocation3 + %s834_s24]] }
  0x4d   : > { %v511_v37 = vmul.f32 %v510_v32, %v508_v11  ;;  %v512_v38 = vmul.f32 %v510_v32, %v509_v12  ;;  %v520_v39 = vstv %s1796_s16  ;;  %v530_v40 = vstv %s526_s18  ;;  %609 = vmatpush.bf16.msra.mxu1 %v1337_v9  ;;  %v486_v11 = vld [vmem:[%s1996_s2] sm:$0xff]  ;;  %s1837_s10 = sld [smem:[#allocation3 + %s808_s25]]  ;;  %s629_s18 = sadd.s32 10, %s1781_s27 }
  0x4e   : > { %v1800_v41 = vadd.f32 %v719_v29, %v714_v33  ;;  %v1802_v42 = vadd.f32 %v720_v30, %v715_v34  ;;  %v521_v43 = vmul.f32 %v520_v39, %v518_v13  ;;  %v522_v44 = vmul.f32 %v520_v39, %v519_v14  ;;  %v487_v13 = vld [vmem:[%s1996_s2 + $0x8] sm:$0xff]  ;;  %s1845_s16 = sld [smem:[#allocation3 + %s622_s19]]  ;;  %s843_s25 = sadd.s32 19, %s1781_s27 }
  0x4f   : > { %v513_v45 = vadd.f32 %v511_v37, %v503_v35  ;;  %v514_v46 = vadd.f32 %v512_v38, %v504_v36  ;;  %v531_v47 = vmul.f32 %v530_v40, %v528_v16  ;;  %v532_v48 = vmul.f32 %v530_v40, %v529_v17  ;;  %s1850_s15 = sld [smem:[#allocation3 + %s629_s18]]  ;;  %s643_s19 = sadd.s32 15, %s1781_s27 }
  0x50   : > { %v723_v49 = vpack.c.bf16 %v1802_v42, %v1800_v41  ;;  %v1600_v12 = vmov 0   ;;  %v619_v19 = vstv %s1842_s20  ;;  %s1889_s13 = sld [smem:[#allocation3 + %s843_s25]]  ;;  %s652_s20 = sadd.s32 16, %s1781_s27 }
  0x51   : > { %v523_v50 = vadd.f32 %v521_v43, %v513_v45  ;;  %v524_v51 = vadd.f32 %v522_v44, %v514_v46  ;;  %610 = vmatpush.bf16.msra.mxu1 %v1336_v10  ;;  %1428 = vset.pattern.permute.xlu1 %v1600_v12  ;;  %v815_v17 = vstv %s1840_s0  ;;  %v831_v10 = vstv %s1886_s12  ;;  %s638_s0 = sadd.s32 14, %s1781_s27  ;;  %s1916_s18 = sld [smem:[#allocation3 + %s652_s20]] }
  0x52   : > { %1286 = vmatmul.msk.bf16.vlgmr.msra.gmra.mxu2 %vm556_vm1, %v723_v49  ;;  %1434 = vset.pattern.permute.xlu0 %v1600_v12  ;;  %s970_s24 = sadd.s32 22, %s1781_s27  ;;  %s1046_s25 = sadd.s32 24, %s1781_s27 }
  0x53   : > { %v1807_v52 = vadd.f32 %v531_v47, %v523_v50  ;;  %v1809_v53 = vadd.f32 %v532_v48, %v524_v51  ;;  %490 = vperm.xlu1 %1428, %v486_v11   ;;  %v810_v16 = vstv %s1837_s10  ;;  %v838_v11 = vstv %s835_s8  ;;  %s1601_s10 = smov 32   ;;  %s971_s12 = sld [smem:[#allocation3 + %s970_s24]] }
  0x54   : > { %v624_v20 = vstv %s1845_s16  ;;  %v811_v21 = vmul.f32 %v810_v16, %v1800_v41  ;;  %v812_v40 = vmul.f32 %v810_v16, %v1802_v42  ;;  %s639_s16 = sld [smem:[#allocation3 + %s638_s0]]  ;;  %s1041_s8 = sadd.s32 23, %s1781_s27 }
  0x55   : > { %v535_v54 = vpack.c.bf16 %v1809_v53, %v1807_v52  ;;  %v620_v26 = vmul.f32 %v619_v19, %v1807_v52  ;;  %v631_v30 = vstv %s1850_s15 }
  0x57   : > { %1261 = vmatmul.msk.bf16.vlgmr.msra.gmra.mxu0 %vm556_vm1, %v535_v54 }
  0x5b   : > { %495 = vperm.xlu1 %1428, %v487_v13  }
  0xc5   : > { %v491_v35 = vpop.permute.xlu1 %490 }
  0xcd   : > { %v1878_v50 = vpop.permute.xlu1 %495 }
  0xd4   : > { %v569_v57 = vpop.f32.mrf.mxu0 }
  0xd5   : > { %v758_v58 = vpop.f32.mrf.mxu2  ;;  %v570_v2 = vadd.f32 %v1436_v61, %v569_v57 }
  0xd6   : > { %v759_v60 = vadd.f32 %v1435_v59, %v758_v58 }
  0xd7   : > { %v574_v6 = vmax.f32 %v570_v2, 0.0  ;;  %v625_v27 = vmul.f32 %v624_v20, %v570_v2 }
  0xd8   : > { %v763_v1 = vmax.f32 %v759_v60, 0.0  ;;  %v816_v22 = vmul.f32 %v815_v17, %v759_v60  ;;  %v1343_v60 = vld [vmem:[%s1754_s26 + $0x8] sm:$0xff] }
  0xd9   : > { %v627_v34 = vadd.f32 %v625_v27, %v620_v26  ;;  %946 = vmatpush.bf16.msrb.mxu0 %v1343_v60 }
  0xda   : > { %v818_v31 = vadd.f32 %v816_v22, %v811_v21 }
  0xdc   : > { %v571_v63 = vpop.f32.mrf.mxu0 }
  0xdd   : > { %v760_v62 = vpop.f32.mrf.mxu2  ;;  %v1821_v4 = vadd.f32 %v1436_v61, %v571_v63 }
  0xde   : > { %v1818_v0 = vadd.f32 %v1435_v59, %v760_v62 }
  0xdf   : > { %v575_v7 = vmax.f32 %v1821_v4, 0.0 }
  0xe0   : > { %v764_v3 = vmax.f32 %v1818_v0, 0.0  ;;  %v817_v41 = vmul.f32 %v815_v17, %v1818_v0  ;;  %v883_v17 = vstv %s1889_s13  ;;  %s1953_s13 = sld [smem:[#allocation3 + %s1046_s25]] }
  0xe1   : > { %v576_v8 = vpack.c.bf16 %v575_v7, %v574_v6 }
  0xe2   : > { %v765_v5 = vpack.c.bf16 %v764_v3, %v763_v1  ;;  %v819_v47 = vadd.f32 %v817_v41, %v812_v40  ;;  %v626_v40 = vmul.f32 %v624_v20, %v1821_v4  ;;  %v1342_v4 = vld [vmem:[%s1754_s26] sm:$0xff]  ;;  %s954_s26 = sadd.s32 20, %s1781_s27 }
  0xe3   : > { %947 = vmatpush.bf16.msrb.mxu0 %v1342_v4  ;;  %s955_s15 = sld [smem:[#allocation3 + %s954_s26]] }
  0xe4   : > { %777 = vrot.lane.b32.xlu0 %v765_v5, %s1599_s17 }
  0xec   : > { %586 = vrot.lane.b32.xlu0 %v576_v8, %s1599_s17  ;;  %s1848_s17 = sld [smem:[#allocation3 + %s820_s14]] }
  0xed   : > { %s644_s14 = sld [smem:[#allocation3 + %s643_s19]] }
  0xf2   : > { %v822_v25 = vstv %s1848_s17  ;;  %s961_s17 = sadd.s32 21, %s1781_s27  ;;  %s1323_s27 = sshll.u32 %s1585_s30, 4 }
  0xf3   : > { %s962_s11 = sld [smem:[#allocation3 + %s961_s17]] }
 0x156   : > { %v778_v14 = vpop.permute.xlu0 %777 }
 0x157   : > { %1300 = vmatmul.msk.bf16.vlgmr.msra.gmra.mxu3 %vm556_vm1, %v778_v14 }
 0x15e   : > { %v587_v15 = vpop.permute.xlu0 %586 }
 0x15f   : > { %1270 = vmatmul.msk.bf16.vlgmr.msra.gmra.mxu1 %vm556_vm1, %v587_v15 }
 0x1da   : > { %v803_v24 = vpop.f32.mrf.mxu3 }
 0x1db   : > { %v804_v28 = vadd.f32 %v1437_v18, %v803_v24 }
 0x1dc   : > { %v612_v29 = vpop.f32.mrf.mxu1 }
 0x1dd   : > { %v823_v32 = vmul.f32 %v822_v25, %v804_v28  ;;  %v613_v33 = vadd.f32 %v1859_v23, %v612_v29 }
 0x1df   : > { %v825_v36 = vadd.f32 %v823_v32, %v818_v31  ;;  %v632_v37 = vmul.f32 %v631_v30, %v613_v33 }
 0x1e1   : > { %v1871_v38 = vmul.f32 %v825_v36, %v491_v35  ;;  %v634_v39 = vadd.f32 %v632_v37, %v627_v34 }
 0x1e2   : > { %v805_v43 = vpop.f32.mrf.mxu3 }
 0x1e3   : > { %v1301_v44 = vmul.f32 -1.442695, %v1871_v38  ;;  %v1876_v45 = vmul.f32 %v634_v39, %v491_v35  ;;  %v806_v46 = vadd.f32 %v1437_v18, %v805_v43  ;;  %v836_v6 = vmax.f32 %v1871_v38, 0.0 }
 0x1e4   : > { %v832_v24 = vmul.f32 %v831_v10, %v1871_v38  ;;  %v614_v37 = vpop.f32.mrf.mxu1  ;;  %v621_v39 = vmul.f32 %v619_v19, %v1809_v53 }
 0x1e5   : > { %1442 = vpow2.f32 %v1301_v44  ;;  %v824_v48 = vmul.f32 %v822_v25, %v806_v46  ;;  %v839_v18 = vmul.f32 %v838_v11, %v836_v6  ;;  %v615_v38 = vadd.f32 %v1859_v23, %v614_v37 }
 0x1e6   : > { %v628_v43 = vadd.f32 %v626_v40, %v621_v39  ;;  %v972_v40 = vstv %s971_s12 }
 0x1e7   : > { %v826_v49 = vadd.f32 %v824_v48, %v819_v47  ;;  %v841_v31 = vadd.f32 %v839_v18, %v832_v24  ;;  %v633_v41 = vmul.f32 %v631_v30, %v615_v38  ;;  %v1271_v47 = vmul.f32 -1.442695, %v1876_v45 }
 0x1e9   : > { %v828_v42 = vmul.f32 %v826_v49, %v1878_v50  ;;  %v635_v44 = vadd.f32 %v633_v41, %v628_v43 }
 0x1eb   : > { %v1443_v51 = vpop.eup %1442  ;;  %v1302_v54 = vmul.f32 -1.442695, %v828_v42  ;;  %v837_v7 = vmax.f32 %v828_v42, 0.0  ;;  %v833_v26 = vmul.f32 %v831_v10, %v828_v42  ;;  %v637_v46 = vmul.f32 %v635_v44, %v1878_v50 }
 0x1ec   : > { %v851_v52 = vadd.f32 1.0, %v1443_v51 }
 0x1ed   : > { %v840_v21 = vmul.f32 %v838_v11, %v837_v7  ;;  %v1272_v48 = vmul.f32 -1.442695, %v637_v46  ;;  %v640_v7 = vstv %s639_s16 }
 0x1ee   : > { %1444 = vrcp.f32 %v851_v52  ;;  %v864_v2 = vand.u32 2147483648, %v851_v52  ;;  %vm858_vm3 = vweird.f32 %v851_v52  ;;  %v862_v3 = vand.u32 2147483647, %v851_v52 }
 0x1ef   : > { %1446 = vpow2.f32 %v1302_v54  ;;  %v842_v32 = vadd.f32 %v840_v21, %v833_v26 }
 0x1f0   : > { %v865_v12 = vor.u32 1.1754944e-38, %v864_v2  ;;  %vm863_vm5 = vcmp.eq.f32.partialorder %v862_v3, 8.507059e+37  ;;  %v647_v3 = vstv %s644_s14 }
 0x1f4   : > { %v1445_v57 = vpop.eup %1444 }
 0x1f5   : > { %v1447_v58 = vpop.eup %1446  ;;  %v854_v59 = vmul.f32 %v1445_v57, %v851_v52  ;;  %vm859_vm2 = vweird.f32 %v1445_v57 }
 0x1f6   : > { %v852_v61 = vadd.f32 1.0, %v1447_v58  ;;  %vm860_vm4 = vmor %vm858_vm3, %vm859_vm2  ;;  %vm936_vm3 = vcmask 523264  }
 0x1f7   : > { %v855_v62 = vsub.f32 1.0, %v854_v59 }
 0x1f8   : > { %1448 = vrcp.f32 %v852_v61  ;;  %v879_v13 = vand.u32 2147483648, %v852_v61  ;;  %v877_v15 = vand.u32 2147483647, %v852_v61  ;;  %vm873_vm7 = vweird.f32 %v852_v61 }
 0x1f9   : > { %v856_v63 = vmul.f32 %v1445_v57, %v855_v62  ;;  %1450 = vpow2.f32 %v1271_v47 }
 0x1fa   : > { %v880_v25 = vor.u32 1.1754944e-38, %v879_v13  ;;  %vm878_vm9 = vcmp.eq.f32.partialorder %v877_v15, 8.507059e+37  ;;  %1452 = vpow2.f32 %v1272_v48  ;;  %v641_v13 = vmul.f32 %v640_v7, %v1876_v45 }
 0x1fb   : > { %v857_v0 = vadd.f32 %v1445_v57, %v856_v63  ;;  %v645_v63 = vmax.f32 %v1876_v45, 0.0 }
 0x1fd   : > { %v861_v8 = vsel %vm860_vm4, %v1445_v57, %v857_v0  ;;  %v646_v0 = vmax.f32 %v637_v46, 0.0  ;;  %v648_v11 = vmul.f32 %v647_v3, %v645_v63 }
 0x1fe   : > { %v1449_v1 = vpop.eup %1448  ;;  %v866_v16 = vsel %vm863_vm5, %v865_v12, %v861_v8 }
 0x1ff   : > { %v869_v5 = vmul.f32 %v1449_v1, %v852_v61  ;;  %vm874_vm6 = vweird.f32 %v1449_v1  ;;  %v884_v28 = vmul.f32 %v883_v17, %v866_v16  ;;  %v1451_v23 = vpop.eup %1450  ;;  %v649_v12 = vmul.f32 %v647_v3, %v646_v0 }
 0x200   : > { %vm875_vm8 = vmor %vm873_vm7, %vm874_vm6  ;;  %v1453_v53 = vpop.eup %1452  ;;  %v660_v19 = vadd.f32 1.0, %v1451_v23 }
 0x201   : > { %v870_v9 = vsub.f32 1.0, %v869_v5  ;;  %v1895_v34 = vadd.f32 %v884_v28, %v841_v31  ;;  %v661_v49 = vadd.f32 1.0, %v1453_v53 }
 0x202   : > { %1454 = vrcp.f32 %v660_v19  ;;  %vm667_vm12 = vweird.f32 %v660_v19  ;;  %v673_v58 = vand.u32 2147483648, %v660_v19  ;;  %v671_v61 = vand.u32 2147483647, %v660_v19 }
 0x203   : > { %v871_v14 = vmul.f32 %v1449_v1, %v870_v9  ;;  %1456 = vrcp.f32 %v661_v49  ;;  %v688_v59 = vand.u32 2147483648, %v661_v49  ;;  %vm682_vm14 = vweird.f32 %v661_v49 }
 0x204   : > { %v686_v62 = vand.u32 2147483647, %v661_v49  ;;  %v674_v5 = vor.u32 1.1754944e-38, %v673_v58  ;;  %vm672_vm0 = vcmp.eq.f32.partialorder %v671_v61, 8.507059e+37  ;;  %v692_v9 = vstv %s1916_s18 }
 0x205   : > { %v872_v22 = vadd.f32 %v1449_v1, %v871_v14  ;;  %v689_v6 = vor.u32 1.1754944e-38, %v688_v59  ;;  %v642_v14 = vmul.f32 %v640_v7, %v637_v46 }
 0x206   : > { %vm687_vm2 = vcmp.eq.f32.partialorder %v686_v62, 8.507059e+37 }
 0x207   : > { %v876_v27 = vsel %vm875_vm8, %v1449_v1, %v872_v22  ;;  %v651_v18 = vadd.f32 %v649_v12, %v642_v14 }
 0x208   : > { %v881_v29 = vsel %vm878_vm9, %v880_v25, %v876_v27  ;;  %v1455_v20 = vpop.eup %1454 }
 0x209   : > { %v885_v33 = vmul.f32 %v883_v17, %v881_v29  ;;  %v1457_v30 = vpop.eup %1456  ;;  %v663_v42 = vmul.f32 %v1455_v20, %v660_v19  ;;  %vm668_vm10 = vweird.f32 %v1455_v20  ;;  %v650_v17 = vadd.f32 %v648_v11, %v641_v13 }
 0x20a   : > { %v678_v50 = vmul.f32 %v1457_v30, %v661_v49  ;;  %vm683_vm11 = vweird.f32 %v1457_v30  ;;  %vm1918_vm13 = vmor %vm667_vm12, %vm668_vm10 }
 0x20b   : > { %v1897_v35 = vadd.f32 %v885_v33, %v842_v32  ;;  %v664_v51 = vsub.f32 1.0, %v663_v42  ;;  %vm684_vm15 = vmor %vm682_vm14, %vm683_vm11  ;;  %v958_v32 = vstv %s955_s15  ;;  %v965_v33 = vstv %s962_s11 }
 0x20c   : > { %v679_v52 = vsub.f32 1.0, %v678_v50 }
 0x20d   : > { %v1429_v36 = vpack.i.bf16 %v1897_v35, %v1895_v34  ;;  %v665_v54 = vmul.f32 %v1455_v20, %v664_v51 }
 0x20e   : > { %v680_v55 = vmul.f32 %v1457_v30, %v679_v52 }
 0x20f   : > { %1430 = vrot.lane.b32.xlu2 %v1429_v36, %s1601_s10  ;;  %v666_v56 = vadd.f32 %v1455_v20, %v665_v54  ;;  %v1439_v36 = vld [vmem:[%s1764_s23 + $0x2] ss:$0 sm:$0xff]  ;;  %s1955_s10 = sld [smem:[#allocation3 + %s1041_s8]] }
 0x210   : > { %v681_v57 = vadd.f32 %v1457_v30, %v680_v55 }
 0x211   : > { %v670_v1 = vsel %vm1918_vm13, %v1455_v20, %v666_v56 }
 0x212   : > { %v685_v2 = vsel %vm684_vm15, %v1457_v30, %v681_v57  ;;  %v675_v8 = vsel %vm672_vm0, %v674_v5, %v670_v1 }
 0x213   : > { %v690_v10 = vsel %vm687_vm2, %v689_v6, %v685_v2  ;;  %v693_v15 = vmul.f32 %v692_v9, %v675_v8 }
 0x214   : > { %v694_v16 = vmul.f32 %v692_v9, %v690_v10 }
 0x215   : > { %v695_v22 = vadd.f32 %v693_v15, %v650_v17  ;;  %v1440_v15 = vld [vmem:[%s1764_s23 + $0x3] ss:$0 sm:$0xff] }
 0x216   : > { %v696_v26 = vadd.f32 %v694_v16, %v651_v18  ;;  %v1441_v18 = vld [vmem:[%s1764_s23 + $0x4] ss:$0 sm:$0xff]  ;;  %s1148_s23 = scalar_lea.vmem [#allocation2], %s1323_s27 }
 0x217   : > { %v956_v29 = vadd.f32 %v1895_v34, %v695_v22  ;;  %v963_v31 = vmul.f32 %v1895_v34, %v695_v22 }
 0x218   : > { %v957_v46 = vadd.f32 %v1897_v35, %v696_v26  ;;  %v964_v47 = vmul.f32 %v1897_v35, %v696_v26 }
 0x219   : > { %v959_v37 = vmul.f32 %v958_v32, %v956_v29  ;;  %v966_v38 = vmul.f32 %v965_v33, %v963_v31 }
 0x21a   : > { %v960_v23 = vmul.f32 %v958_v32, %v957_v46  ;;  %v967_v53 = vmul.f32 %v965_v33, %v964_v47 }
 0x21b   : > { %v968_v43 = vadd.f32 %v966_v38, %v959_v37 }
 0x21c   : > { %v969_v30 = vadd.f32 %v967_v53, %v960_v23 }
 0x269   : > { %v1431_v21 = vpop.permute.xlu2 %1430 }
 0x26a   : > { %v1433_v24 = vunpack.i.h.bf16 %v1431_v21  ;;  %v1432_v25 = vunpack.i.l.bf16 %v1431_v21 }
 0x26c   : > { %v896_v27 = vsel %vm556_vm1, %v695_v22, %v1432_v25  ;;  %v897_v28 = vsel %vm556_vm1, %v696_v26, %v1433_v24  ;;  %v1048_v26 = vstv %s1953_s13 }
 0x26d   : > { %v898_v45 = vpack.c.bf16 %v897_v28, %v896_v27  ;;  %v1043_v27 = vstv %s1955_s10 }
 0x26f   : > { %1320 = vmatmul.msk.bf16.vlgmr.msrb.gmra.mxu0 %vm936_vm3, %v898_v45 }
 0x2ec   : > { %v949_v39 = vpop.f32.mrf.mxu0 }
 0x2ed   : > { %v950_v41 = vadd.f32 %v1439_v36, %v949_v39 }
 0x2ef   : > { %v973_v44 = vmul.f32 %v972_v40, %v950_v41 }
 0x2f1   : > { %v1937_v48 = vadd.f32 %v973_v44, %v968_v43 }
 0x2f3   : > { %v977_v34 = vsel %vm556_vm1, %v1937_v48, 0.0  ;;  %v985_v19 = vmul.f32 %v1937_v48, %v1937_v48  ;;  %v1049_v29 = vmul.f32 %v1048_v26, %v1937_v48 }
 0x2f4   : > { %v951_v49 = vpop.f32.mrf.mxu0  ;;  %978 = vadd.xlane.f32.xlu2 %v977_v34 }
 0x2f5   : > { %v952_v4 = vadd.f32 %v1439_v36, %v951_v49  ;;  %v987_v20 = vsel %vm556_vm1, %v985_v19, 0.0 }
 0x2f6   : > { %988 = vadd.xlane.f32.xlu1 %v987_v20 }
 0x2f7   : > { %v974_v42 = vmul.f32 %v972_v40, %v952_v4 }
 0x2f9   : > { %v1944_v50 = vadd.f32 %v974_v42, %v969_v30 }
 0x2fb   : > { %v980_v35 = vsel %vm556_vm1, %v1944_v50, 0.0  ;;  %v986_v51 = vmul.f32 %v1944_v50, %v1944_v50  ;;  %v1050_v41 = vmul.f32 %v1048_v26, %v1944_v50 }
 0x2fc   : > { %981 = vadd.xlane.f32.xlu0 %v980_v35 }
 0x2fd   : > { %v990_v52 = vsel %vm556_vm1, %v986_v51, 0.0 }
 0x2fe   : > { %991 = vadd.xlane.f32.xlu2 %v990_v52 }
 0x367   : > { %v979_v54 = vpop.xlane.xlu2 %978 }
 0x368   : > { %v983_v55 = vmul.f32 0.03125, %v979_v54 }
 0x369   : > { %v989_v56 = vpop.xlane.xlu1 %988 }
 0x36a   : > { %v995_v57 = vmul.f32 %v983_v55, %v983_v55  ;;  %v993_v58 = vmul.f32 0.03125, %v989_v56  ;;  %v1001_v14 = vsub.f32 %v1937_v48, %v983_v55 }
 0x36c   : > { %v997_v59 = vsub.f32 %v993_v58, %v995_v57 }
 0x36e   : > { %v999_v60 = vmax.f32 %v997_v59, 0.0 }
 0x36f   : > { %v982_v61 = vpop.xlane.xlu0 %981 }
 0x370   : > { %v1003_v62 = vadd.f32 1e-05, %v999_v60  ;;  %v984_v63 = vmul.f32 0.03125, %v982_v61 }
 0x371   : > { %v992_v0 = vpop.xlane.xlu2 %991 }
 0x372   : > { %1458 = vrsqrt.f32 %v1003_v62  ;;  %v996_v1 = vmul.f32 %v984_v63, %v984_v63  ;;  %v994_v2 = vmul.f32 0.03125, %v992_v0  ;;  %vm1011_vm5 = vweird.f32 %v1003_v62 }
 0x373   : > { %v1002_v33 = vsub.f32 %v1944_v50, %v984_v63 }
 0x374   : > { %v998_v3 = vsub.f32 %v994_v2, %v996_v1 }
 0x376   : > { %v1000_v5 = vmax.f32 %v998_v3, 0.0 }
 0x378   : > { %v1459_v6 = vpop.eup %1458  ;;  %v1004_v8 = vadd.f32 1e-05, %v1000_v5 }
 0x379   : > { %v1006_v7 = vmul.f32 %v1459_v6, %v1003_v62  ;;  %vm1012_vm4 = vweird.f32 %v1459_v6 }
 0x37a   : > { %1460 = vrsqrt.f32 %v1004_v8  ;;  %vm1013_vm6 = vmor %vm1011_vm5, %vm1012_vm4  ;;  %vm1021_vm8 = vweird.f32 %v1004_v8 }
 0x37b   : > { %v1007_v9 = vmul.f32 %v1459_v6, %v1006_v7 }
 0x37d   : > { %v1008_v10 = vmul.f32 0.5, %v1007_v9 }
 0x37f   : > { %v1009_v11 = vsub.f32 1.5, %v1008_v10 }
 0x380   : > { %v1461_v12 = vpop.eup %1460 }
 0x381   : > { %v1010_v13 = vmul.f32 %v1459_v6, %v1009_v11  ;;  %v1016_v16 = vmul.f32 %v1461_v12, %v1004_v8  ;;  %vm1022_vm7 = vweird.f32 %v1461_v12 }
 0x382   : > { %vm1023_vm9 = vmor %vm1021_vm8, %vm1022_vm7 }
 0x383   : > { %v1014_v17 = vsel %vm1013_vm6, %v1459_v6, %v1010_v13  ;;  %v1017_v22 = vmul.f32 %v1461_v12, %v1016_v16 }
 0x384   : > { %v1025_v21 = vmul.f32 %v1014_v17, %v1001_v14 }
 0x385   : > { %v1018_v25 = vmul.f32 0.5, %v1017_v22 }
 0x386   : > { %v1032_v24 = vmul.f32 %v1440_v15, %v1025_v21 }
 0x387   : > { %v1019_v45 = vsub.f32 1.5, %v1018_v25 }
 0x388   : > { %v1039_v28 = vadd.f32 %v1441_v18, %v1032_v24 }
 0x389   : > { %v1020_v32 = vmul.f32 %v1461_v12, %v1019_v45 }
 0x38a   : > { %v1044_v31 = vmul.f32 %v1043_v27, %v1039_v28 }
 0x38b   : > { %v1024_v37 = vsel %vm1023_vm9, %v1461_v12, %v1020_v32 }
 0x38c   : > { %v1051_v36 = vadd.f32 %v1049_v29, %v1044_v31  ;;  %v1026_v38 = vmul.f32 %v1024_v37, %v1002_v33 }
 0x38e   : > { %1324 = vst.msk [vmem:[%s1148_s23 + $0x20] sm:$0xff] %vm556_vm1, %v1051_v36  ;;  %v1033_v39 = vmul.f32 %v1440_v15, %v1026_v38 }
 0x390   : > { %v1040_v40 = vadd.f32 %v1441_v18, %v1033_v39 }
 0x392   : > { %v1045_v43 = vmul.f32 %v1043_v27, %v1040_v40  ;;  %1061 = sbr.rel (%p1326_p3) target bundleno = 921 (0x399), region = 68 }
 0x394   : > { %v1052_v44 = vadd.f32 %v1050_v41, %v1045_v43 }
 0x396   : > { %1325 = vst.msk [vmem:[%s1148_s23 + $0x28] sm:$0xff] %vm556_vm1, %v1052_v44 }
 0x397   : > { %1062 = vst.msk [vmem:[#allocation8] sm:$0xff] %vm556_vm1, %v1051_v36 }
 0x398   : > { %1063 = vst.msk [vmem:[#allocation8 + $0x8] sm:$0xff] %vm556_vm1, %v1052_v44 }
 0x399 PF: > { %s2016_s19 = sld [smem:[#allocation12_spill]]  ;;  %s1602_s26 = smov [#allocation8]  }
 0x39a   : > { %s2018_s16 = sld [smem:[#allocation14_spill]]  ;;  %s1072_s17 = sshll.u32 %s1602_s26, 4  ;;  %s1073_s17 = int_to_ptr.vmem [resolvable:$true] %s1072_s17 }
 0x39b   : > { %s1603_s15 = smov 128   ;;  %s1604_s11 = smov 8  }
 0x39f   : > { %s2017_s0 = sadd.s32 4294967295, %s2016_s19  }
 0x3a0   : > { %p1368_p4 = scmp.eq.s32.totalorder %s2017_s0, 2  ;;  %s1074_s18 = sshll.u32 %s2018_s16, 4  ;;  %s1075_s18 = int_to_ptr.hbm [resolvable:$true] %s1074_s18 }
 0x3a2   : > { %1354 = dma.vmem_to_hbm [thread:$0]  (%p1368_p4), %s1073_s17, 256, %s1075_s18, [#allocation5], %s1603_s15, %s1603_s15, %s1604_s11  }
 0x3a3   : > { %1568 = dma.done.wait (%p1368_p4), [#allocation5], 256  }
 0x3a4   : > { %1570 = vsyncadd (%p1368_p4), [#allocation5], 4294967040 }
 0x3a5 PF: > { %s2019_s30 = sld [smem:[#allocation12_spill]]  ;;  %s2020_s27 = smov %s1577_s28 }
 0x3a6   : > { %s2021_s28 = smov %s1581_s29  ;;  %s2022_s29 = smov %s1727_s21 }
 0x3ab   : > { %s23_s10 = sadd.s32 1, %s2019_s30   ;;  %s2023_s30 = smov %s1589_s9 }
 0x3ac   : > { %p20_p5 = scmp.ge.s32.totalorder %s23_s10, 5   ;;  %s2024_s9 = smov %s2026_s22 }
 0x3ae   :  { %22 = sbr.rel (!%p20_p5) target bundleno = 9 (0x9), region = 136 }
 0x3b3   :  { %1091 = vsyncpa [#allocation4], 1 }
 0x3b4   :  { %1093 = vsyncpa [#allocation4 + $0x1], 1 }
 0x3b5   :  { %1094 = vsyncpa [#allocation5], 1 }
 0x3b6   :  { %1096 = vsyncpa [#allocation5 + $0x1], 1 }
 0x3b7   :  { %1097 = vsyncpa [#allocation6], 1 }
 0x3b8   :  { %1099 = vsyncpa [#allocation6 + $0x1], 1 }

</bundles_post_ra>
